<compile_context>
chip_gen: v7x
topology: tpu7x:2x2x1
jax: 0.10.0
libtpu: 0.0.40
codegen_flags: <defaults>
</compile_context>

<pallas_src>
import functools

import jax
import jax.numpy as jnp
import numpy as np
from jax.experimental import pallas as pl
from jax.experimental.pallas import tpu as pltpu


def _round_up(x, m):
    return ((x + m - 1) // m) * m


# Budget for v7x's 64 MiB physical VMEM (also fine on v5e/v6e 128 MiB).
_VMEM_LIMIT = 48 * 1024 * 1024


# ----------------------------------------------------------------------------
# Kernel 1: fused src/dst projection + per-head attention logits (row-tiled)
# ----------------------------------------------------------------------------
def _gat_proj_kernel(x_ref, w_ref, asrc_ref, adst_ref,
                     xs_ref, as_ref, ad_ref, *, HC):
    # One wide bf16 MXU matmul for both projections; f32 accumulation.
    xb = x_ref[...].astype(jnp.bfloat16)
    wb = w_ref[...].astype(jnp.bfloat16)
    proj = jnp.dot(xb, wb, preferred_element_type=jnp.float32)       # (TM, 2*H*C)
    xs = proj[:, :HC]                                                # src-projected
    xd = proj[:, HC:]                                                # dst-projected
    xs_ref[...] = xs.astype(jnp.bfloat16)                            # kept bf16
    # Per-head logit reductions as block-diagonal matmuls (f32).
    as_ref[...] = jnp.dot(xs, asrc_ref[...], preferred_element_type=jnp.float32)
    ad_ref[...] = jnp.dot(xd, adst_ref[...], preferred_element_type=jnp.float32)


# ----------------------------------------------------------------------------
# Kernel 2: masked softmax + attention-weighted aggregation (row-tiled)
# ----------------------------------------------------------------------------
def _gat_agg_kernel(adj_ref, adst_ref, asrc_ref, xs_ref, bias_ref, out_ref,
                    *, H, C, concat):
    adj = adj_ref[...].astype(jnp.float32)          # (TM, N) 0/1, cast once
    mask = adj > 0.0                                # hoisted out of head loop
    a_dst = adst_ref[...]                           # (TM, H) f32
    a_src = asrc_ref[...]                           # (H, N)  f32
    xs = xs_ref[...]                                # (N, H*C) bf16

    outs = []
    acc = None
    for h in range(H):                              # static unroll, H <= 8
        e = a_dst[:, h:h + 1] + a_src[h:h + 1, :]   # (TM, N) logits
        e = jnp.maximum(e, 0.2 * e)                 # LeakyReLU(0.2)
        e = jnp.where(mask, e, -1e30)               # mask non-edges
        m = jnp.max(e, axis=1, keepdims=True)
        p = jnp.exp(e - m) * adj                    # re-zero non-edges (adj is 0/1)
        denom = jnp.sum(p, axis=1, keepdims=True) + 1e-16   # PyG softmax eps
        out_h = jnp.dot(p.astype(jnp.bfloat16), xs[:, h * C:(h + 1) * C],
                        preferred_element_type=jnp.float32)  # (TM, C)
        out_h = out_h * pl.reciprocal(denom, approx=True)    # scale after matmul
        if concat:
            outs.append(out_h)
        else:
            acc = out_h if acc is None else acc + out_h

    result = jnp.concatenate(outs, axis=1) if concat else acc * (1.0 / H)
    out_ref[...] = result + bias_ref[...]           # single lane-dense store


# ----------------------------------------------------------------------------
# Kernel 3: decoder linear
# ----------------------------------------------------------------------------
def _linear_kernel(x_ref, w_ref, b_ref, out_ref):
    out_ref[...] = jnp.dot(x_ref[...], w_ref[...],
                           preferred_element_type=jnp.float32) + b_ref[...]


# ----------------------------------------------------------------------------
# One GATConv layer (x and adj already row-padded to a multiple of tm)
# ----------------------------------------------------------------------------
def gat_conv(x, adj_bf16, p, tm):
    n_pad, f_in = x.shape
    H, C, concat = p["heads"], p["out_channels"], p["concat"]
    HC = H * C
    out_dim = HC if concat else C
    grid = (n_pad // tm,)
    cparams = pltpu.CompilerParams(dimension_semantics=("parallel",),
                                   vmem_limit_bytes=_VMEM_LIMIT)

    # Fused [W_src | W_dst] and block-diagonal per-head attention vectors.
    w_cat = jnp.concatenate([p["w_src"], p["w_dst"]], axis=1)        # (Fin, 2*H*C)
    asrc_blk = jax.scipy.linalg.block_diag(
        *[p["att_src"][h:h + 1, :] for h in range(H)]).T             # (H*C, H)
    adst_blk = jax.scipy.linalg.block_diag(
        *[p["att_dst"][h:h + 1, :] for h in range(H)]).T             # (H*C, H)
    bias2d = p["bias"].reshape(1, out_dim)

    xs, a_src_nh, a_dst = pl.pallas_call(
        functools.partial(_gat_proj_kernel, HC=HC),
        out_shape=(jax.ShapeDtypeStruct((n_pad, HC), jnp.bfloat16),
                   jax.ShapeDtypeStruct((n_pad, H), jnp.float32),
                   jax.ShapeDtypeStruct((n_pad, H), jnp.float32)),
        grid_spec=pltpu.PrefetchScalarGridSpec(
            num_scalar_prefetch=0, grid=grid,
            in_specs=[pl.BlockSpec((tm, f_in), lambda i: (i, 0)),     # x row tile
                      pl.BlockSpec((f_in, 2 * HC), lambda i: (0, 0)),  # W resident
                      pl.BlockSpec((HC, H), lambda i: (0, 0)),
                      pl.BlockSpec((HC, H), lambda i: (0, 0))],
            out_specs=[pl.BlockSpec((tm, HC), lambda i: (i, 0)),
                       pl.BlockSpec((tm, H), lambda i: (i, 0)),
                       pl.BlockSpec((tm, H), lambda i: (i, 0))]),
        compiler_params=cparams,
    )(x, w_cat, asrc_blk, adst_blk)

    a_src_hn = a_src_nh.T                                            # (H, N) glue

    out = pl.pallas_call(
        functools.partial(_gat_agg_kernel, H=H, C=C, concat=concat),
        out_shape=jax.ShapeDtypeStruct((n_pad, out_dim), jnp.float32),
        grid_spec=pltpu.PrefetchScalarGridSpec(
            num_scalar_prefetch=0, grid=grid,
            in_specs=[pl.BlockSpec((tm, n_pad), lambda i: (i, 0)),    # adj row tile
                      pl.BlockSpec((tm, H), lambda i: (i, 0)),         # a_dst tile
                      pl.BlockSpec((H, n_pad), lambda i: (0, 0)),      # a_src resident
                      pl.BlockSpec((n_pad, HC), lambda i: (0, 0)),     # xs resident
                      pl.BlockSpec((1, out_dim), lambda i: (0, 0))],   # bias resident
            out_specs=pl.BlockSpec((tm, out_dim), lambda i: (i, 0))),
        compiler_params=cparams,
    )(adj_bf16, a_dst, a_src_hn, xs, bias2d)
    return out


def linear_decode(z, w, b):
    n_pad = z.shape[0]
    nc = w.shape[1]
    vmem = lambda: pl.BlockSpec(memory_space=pltpu.MemorySpace.VMEM)
    return pl.pallas_call(
        _linear_kernel,
        out_shape=jax.ShapeDtypeStruct((n_pad, nc), jnp.float32),
        in_specs=[vmem(), vmem(), vmem()],
        out_specs=vmem(),
    )(z, w, b.reshape(1, nc))


# ----------------------------------------------------------------------------
# GAT_NC forward (both two_layers branches + decoder), with row padding
# ----------------------------------------------------------------------------
def gat_nc_forward(params, x, adj, two_layers, row_tile=256):
    N = x.shape[0]
    tm = min(row_tile, _round_up(N, 8))
    n_pad = _round_up(N, tm)
    x_p = jnp.pad(x, ((0, n_pad - N), (0, 0)))
    adj_p = jnp.pad(adj, ((0, n_pad - N), (0, n_pad - N))).astype(jnp.bfloat16)

    if two_layers:
        h = gat_conv(x_p, adj_p, params["conv1b"], tm)
        h = jnp.maximum(h, 0.0)
        h = gat_conv(h, adj_p, params["conv2b"], tm)
    else:
        h = gat_conv(x_p, adj_p, params["conv1"], tm)
        h = jnp.maximum(h, 0.0)
        h = gat_conv(h, adj_p, params["conv2"], tm)
        h = jnp.maximum(h, 0.0)
        h = gat_conv(h, adj_p, params["conv3"], tm)
    out = linear_decode(h, params["dec_w"], params["dec_b"])
    return out[:N]


# ----------------------------------------------------------------------------
# Pure-JAX reference (f32, dense formulation) for a sanity check
# ----------------------------------------------------------------------------
def gat_conv_ref(x, adj, p):
    H, C, concat = p["heads"], p["out_channels"], p["concat"]
    xs = (x @ p["w_src"]).reshape(-1, H, C)
    xd = (x @ p["w_dst"]).reshape(-1, H, C)
    a_src = jnp.einsum("nhc,hc->nh", xs, p["att_src"])
    a_dst = jnp.einsum("nhc,hc->nh", xd, p["att_dst"])
    e = a_dst[:, None, :] + a_src[None, :, :]                        # (Ni, Nj, H)
    e = jnp.where(e >= 0.0, e, 0.2 * e)
    mask = adj[:, :, None] > 0.0
    e = jnp.where(mask, e, -1e30)
    m = jnp.max(e, axis=1, keepdims=True)
    pr = jnp.where(mask, jnp.exp(e - m), 0.0)
    attn = pr / (jnp.sum(pr, axis=1, keepdims=True) + 1e-16)
    out = jnp.einsum("ijh,jhc->ihc", attn, xs)
    out = out.reshape(out.shape[0], H * C) if concat else out.mean(axis=1)
    return out + p["bias"]


def gat_nc_forward_ref(params, x, adj, two_layers):
    if two_layers:
        z = jnp.maximum(gat_conv_ref(x, adj, params["conv1b"]), 0.0)
        z = gat_conv_ref(z, adj, params["conv2b"])
    else:
        z = jnp.maximum(gat_conv_ref(x, adj, params["conv1"]), 0.0)
        z = jnp.maximum(gat_conv_ref(z, adj, params["conv2"]), 0.0)
        z = gat_conv_ref(z, adj, params["conv3"])
    return z @ params["dec_w"] + params["dec_b"]


# ----------------------------------------------------------------------------
# Deterministic parameter init (shapes follow PyG GATConv with (-1,-1) inputs)
# ----------------------------------------------------------------------------
def init_gatconv(key, in_dim, out_channels, heads, concat):
    H, C = heads, out_channels
    k1, k2, k3, k4 = jax.random.split(key, 4)
    w_scale = (2.0 / (in_dim + H * C)) ** 0.5                        # glorot-ish
    return {
        "w_src": w_scale * jax.random.normal(k1, (in_dim, H * C), jnp.float32),
        "w_dst": w_scale * jax.random.normal(k2, (in_dim, H * C), jnp.float32),
        "att_src": 0.1 * jax.random.normal(k3, (H, C), jnp.float32),
        "att_dst": 0.1 * jax.random.normal(k4, (H, C), jnp.float32),
        "bias": jnp.zeros((H * C if concat else C,), jnp.float32),   # PyG zero-init
        "heads": H, "out_channels": C, "concat": concat,
    }


if __name__ == "__main__":
    hidden_channels, embedding_size, heads, num_classes = 32, 8, 8, 4
    N, F_in, E = 30, 16, 128             # N not a multiple of 8 -> exercises padding
    row_tile = 8                          # small tile so the row-block grid is exercised

    key = jax.random.PRNGKey(0)
    kx, ks, kd, kp = jax.random.split(key, 4)
    x = jax.random.normal(kx, (N, F_in), jnp.float32)
    src = jax.random.randint(ks, (E,), 0, N)
    dst = jax.random.randint(kd, (E,), 0, N)
    # edge_index = stack([src, dst]); dense mask adj[i, j] = 1 iff edge j -> i.
    adj = jnp.zeros((N, N), jnp.float32).at[dst, src].set(1.0)

    keys = jax.random.split(kp, 7)
    params = {
        "conv1": init_gatconv(keys[0], F_in, hidden_channels, heads, True),
        "conv2": init_gatconv(keys[1], hidden_channels * heads, 48, heads, True),
        "conv3": init_gatconv(keys[2], 48 * heads, embedding_size, 1, False),
        "conv1b": init_gatconv(keys[3], F_in, hidden_channels, heads, True),
        "conv2b": init_gatconv(keys[4], hidden_channels * heads, embedding_size, 1, False),
        "dec_w": 0.3 * jax.random.normal(keys[5], (embedding_size, num_classes), jnp.float32),
        "dec_b": 0.05 * jax.random.normal(keys[6], (num_classes,), jnp.float32),
    }

    for two_layers in (False, True):
        out = jax.block_until_ready(
            gat_nc_forward(params, x, adj, two_layers, row_tile=row_tile))
        ref = gat_nc_forward_ref(params, x, adj, two_layers)
        assert out.shape == (N, num_classes), out.shape
        assert bool(jnp.all(jnp.isfinite(out)))
        np.testing.assert_allclose(np.asarray(out), np.asarray(ref),
                                   rtol=5e-2, atol=5e-2)
    print("KERNEL_OK")
</pallas_src>

<mosaic_0001>
module attributes {stable_mosaic.version = 11 : i64} {
  func.func @_gat_proj_kernel(%arg0: i32, %arg1: memref<8x16xf32, #tpu.memory_space<vmem>>, %arg2: memref<16x512xf32, #tpu.memory_space<vmem>>, %arg3: memref<256x8xf32, #tpu.memory_space<vmem>>, %arg4: memref<256x8xf32, #tpu.memory_space<vmem>>, %arg5: memref<8x256xbf16, #tpu.memory_space<vmem>>, %arg6: memref<8x8xf32, #tpu.memory_space<vmem>>, %arg7: memref<8x8xf32, #tpu.memory_space<vmem>>) attributes {dimension_semantics = [#tpu.dimension_semantics<parallel>], iteration_bounds = array<i64: 4>, scalar_prefetch = 0 : i64, scratch_operands = 0 : i64, tpu.core_type = #tpu.core_type<tc>, window_params = [{transform_indices = @transform_0, window_bounds = array<i64: 8, 16>}, {pipeline_mode = #tpu.pipeline_mode<synchronous>, transform_indices = @transform_1, window_bounds = array<i64: 16, 512>}, {pipeline_mode = #tpu.pipeline_mode<synchronous>, transform_indices = @transform_2, window_bounds = array<i64: 256, 8>}, {pipeline_mode = #tpu.pipeline_mode<synchronous>, transform_indices = @transform_3, window_bounds = array<i64: 256, 8>}, {transform_indices = @transform_4, window_bounds = array<i64: 8, 256>}, {transform_indices = @transform_5, window_bounds = array<i64: 8, 8>}, {transform_indices = @transform_6, window_bounds = array<i64: 8, 8>}]} {
    %c0 = arith.constant 0 : index
    %c0_0 = arith.constant 0 : index
    %0 = vector.load %arg1[%c0, %c0_0] : memref<8x16xf32, #tpu.memory_space<vmem>>, vector<8x16xf32>
    %1 = arith.truncf %0 : vector<8x16xf32> to vector<8x16xbf16>
    %c0_1 = arith.constant 0 : index
    %c0_2 = arith.constant 0 : index
    %2 = vector.load %arg2[%c0_1, %c0_2] : memref<16x512xf32, #tpu.memory_space<vmem>>, vector<16x512xf32>
    %3 = arith.truncf %2 : vector<16x512xf32> to vector<16x512xbf16>
    %cst = arith.constant dense<0.000000e+00> : vector<8x512xf32>
    %4 = tpu.matmul %1, %3, %cst {dimension_numbers = #tpu.dot_dimension_numbers<[1], [0], [0], [1], [0, 0, 1, 1], [], []>} : vector<8x16xbf16>, vector<16x512xbf16>, vector<8x512xf32> -> vector<8x512xf32>
    %5 = vector.extract_strided_slice %4 {offsets = [0, 0], sizes = [8, 256], strides = [1, 1]} : vector<8x512xf32> to vector<8x256xf32>
    %6 = vector.extract_strided_slice %4 {offsets = [0, 256], sizes = [8, 256], strides = [1, 1]} : vector<8x512xf32> to vector<8x256xf32>
    %7 = arith.truncf %5 : vector<8x256xf32> to vector<8x256xbf16>
    %c0_3 = arith.constant 0 : index
    %c0_4 = arith.constant 0 : index
    %8 = vector.load %arg5[%c0_3, %c0_4] : memref<8x256xbf16, #tpu.memory_space<vmem>>, vector<8x256xbf16>
    tpu.vector_store %arg5[%c0_3, %c0_4], %7 {strides = array<i32>} : memref<8x256xbf16, #tpu.memory_space<vmem>>, vector<8x256xbf16>,
    %c0_5 = arith.constant 0 : index
    %c0_6 = arith.constant 0 : index
    %9 = vector.load %arg3[%c0_5, %c0_6] : memref<256x8xf32, #tpu.memory_space<vmem>>, vector<256x8xf32>
    %cst_7 = arith.constant dense<0.000000e+00> : vector<8x8xf32>
    %10 = tpu.matmul %5, %9, %cst_7 {dimension_numbers = #tpu.dot_dimension_numbers<[1], [0], [0], [1], [0, 0, 1, 1], [], []>} : vector<8x256xf32>, vector<256x8xf32>, vector<8x8xf32> -> vector<8x8xf32>
    %c0_8 = arith.constant 0 : index
    %c0_9 = arith.constant 0 : index
    %11 = vector.load %arg6[%c0_8, %c0_9] : memref<8x8xf32, #tpu.memory_space<vmem>>, vector<8x8xf32>
    tpu.vector_store %arg6[%c0_8, %c0_9], %10 {strides = array<i32>} : memref<8x8xf32, #tpu.memory_space<vmem>>, vector<8x8xf32>,
    %c0_10 = arith.constant 0 : index
    %c0_11 = arith.constant 0 : index
    %12 = vector.load %arg4[%c0_10, %c0_11] : memref<256x8xf32, #tpu.memory_space<vmem>>, vector<256x8xf32>
    %cst_12 = arith.constant dense<0.000000e+00> : vector<8x8xf32>
    %13 = tpu.matmul %6, %12, %cst_12 {dimension_numbers = #tpu.dot_dimension_numbers<[1], [0], [0], [1], [0, 0, 1, 1], [], []>} : vector<8x256xf32>, vector<256x8xf32>, vector<8x8xf32> -> vector<8x8xf32>
    %c0_13 = arith.constant 0 : index
    %c0_14 = arith.constant 0 : index
    %14 = vector.load %arg7[%c0_13, %c0_14] : memref<8x8xf32, #tpu.memory_space<vmem>>, vector<8x8xf32>
    tpu.vector_store %arg7[%c0_13, %c0_14], %13 {strides = array<i32>} : memref<8x8xf32, #tpu.memory_space<vmem>>, vector<8x8xf32>,
    return
  }
  func.func @transform_0(%arg0: i32) -> (i32, i32) {
    %c0_i32 = arith.constant 0 : i32
    %c0_i32_0 = arith.constant 0 : i32
    return %arg0, %c0_i32 : i32, i32
  }
  func.func @transform_1(%arg0: i32) -> (i32, i32) {
    %c0_i32 = arith.constant 0 : i32
    %c0_i32_0 = arith.constant 0 : i32
    %c0_i32_1 = arith.constant 0 : i32
    return %c0_i32, %c0_i32_0 : i32, i32
  }
  func.func @transform_2(%arg0: i32) -> (i32, i32) {
    %c0_i32 = arith.constant 0 : i32
    %c0_i32_0 = arith.constant 0 : i32
    %c0_i32_1 = arith.constant 0 : i32
    return %c0_i32, %c0_i32_0 : i32, i32
  }
  func.func @transform_3(%arg0: i32) -> (i32, i32) {
    %c0_i32 = arith.constant 0 : i32
    %c0_i32_0 = arith.constant 0 : i32
    %c0_i32_1 = arith.constant 0 : i32
    return %c0_i32, %c0_i32_0 : i32, i32
  }
  func.func @transform_4(%arg0: i32) -> (i32, i32) {
    %c0_i32 = arith.constant 0 : i32
    %c0_i32_0 = arith.constant 0 : i32
    return %arg0, %c0_i32 : i32, i32
  }
  func.func @transform_5(%arg0: i32) -> (i32, i32) {
    %c0_i32 = arith.constant 0 : i32
    %c0_i32_0 = arith.constant 0 : i32
    return %arg0, %c0_i32 : i32, i32
  }
  func.func @transform_6(%arg0: i32) -> (i32, i32) {
    %c0_i32 = arith.constant 0 : i32
    %c0_i32_0 = arith.constant 0 : i32
    return %arg0, %c0_i32 : i32, i32
  }
}

</mosaic_0001>

<bundles_post_ra>
// kernel: tpu_custom_call.1
= control target key start
LH: loop header
LB: loop body
LE: loop exit
PB: predicated region body
PF: predicated region fallthrough
CT: control target
= control target key end

     0   :  { %12 = vsyncpa [#allocation3], 0  ;;  %s1337_s0 = inlined_call_operand.vmem [shape: f32[32,16], index: 0, kind: input, shape index: {}]   ;;  %s1338_s1 = inlined_call_operand.vmem [shape: f32[16,512], index: 1, kind: input, shape index: {}]   ;;  %s1339_s2 = inlined_call_operand.vmem [shape: f32[256,8], index: 2, kind: input, shape index: {}]   ;;  %s1340_s3 = inlined_call_operand.vmem [shape: f32[256,8], index: 3, kind: input, shape index: {}]   ;;  %s1341_s4 = inlined_call_operand.hbm [shape: bf16[32,256], index: 4, kind: output, shape index: {0}]   ;;  %s1342_s5 = inlined_call_operand.vmem [shape: f32[32,8], index: 5, kind: output, shape index: {1}]   ;;  %s1343_s6 = inlined_call_operand.vmem [shape: f32[32,8], index: 6, kind: output, shape index: {2}]  }
   0x1   :  { %14 = vsyncpa [#allocation3 + $0x1], 0  ;;  %s1014_s21 = smov 0   ;;  %s1016_s22 = smov 0  }
   0x2   :  { %s1018_s23 = smov 0   ;;  %s1020_s24 = smov 0  }
   0x3 LB: > { %s1035_s25 = sadd.s32 4294967295, %s975_s24   ;;  %s721_s26 = sadd.s32 4294967294, %s975_s24   ;;  %s975_s24 = sphi %s1020_s24, %s1349_s24   ;;  %s971_s23 = sphi %s1018_s23, %s1348_s23   ;;  %s967_s22 = sphi %s1016_s22, %s1347_s22   ;;  %s963_s21 = sphi %s1014_s21, %s1346_s21  }
   0x4   : > { %s1039_s27 = sadd.s32 1, %s975_s24   ;;  %s116_s28 = sadd.s32 1, %s971_s23 }
   0x5   : > { %s113_s29 = ssub.s32 %s975_s24, %s1039_s27  ;;  %p126_p0 = scmp.ne.s32.totalorder %s971_s23, %s967_s22 }
   0x6   : > { %p114_p1 = scmp.eq.s32.totalorder %s113_s29, 0  ;;  %p127_p2 = scmp.eq.s32.totalorder %s1035_s25, 3 }
   0x7   : > { %p132_p3 = scmp.ne.s32.totalorder %s967_s22, %s963_s21  ;;  %p133_p4 = scmp.eq.s32.totalorder %s721_s26, 3 }
   0x8   : > { %s1050_s30 = scalar_select %p114_p1, %s971_s23, %s116_s28  }
   0x9   : > { %p1052_p5 = por %p127_p2, %p126_p0  ;;  %p1056_p6 = por %p133_p4, %p132_p3 }
   0xa   : > { %p724_p7 = scmp.ge.s32.totalorder %s975_s24, 1  ;;  %p219_p8 = scmp.lt.s32.totalorder %s975_s24, 5 }
   0xc   : > { %p220_p9 = pnand %p724_p7, %p219_p8 }
   0xd   : > { %v272_v0 = vld [vmem:[%s1338_s1 + $0x8] sm:$0xff] (!%p220_p9)  ;;  %v274_v2 = vld [vmem:[%s1338_s1 + $0x18] sm:$0xff] (!%p220_p9)  ;;  %p256_p10 = scmp.lt.s32.totalorder (!%p220_p9), %s1035_s25, 3  ;;  %v271_v5 = vld [vmem:[%s1338_s1] sm:$0xff] (!%p220_p9)  ;;  %v977_v7 = vmov (!%p220_p9), 0   ;;  %vm283_vm0 = vcmask (!%p220_p9), 130048  }
   0xe   : > { %223 = sbr.rel (%p220_p9) target bundleno = 458 (0x1ca), region = 36  ;;  %v276_v1 = vld [vmem:[%s1338_s1 + $0x28] sm:$0xff] (!%p220_p9)  ;;  %v278_v4 = vld [vmem:[%s1338_s1 + $0x38] sm:$0xff] (!%p220_p9)  ;;  %v275_v6 = vld [vmem:[%s1338_s1 + $0x20] sm:$0xff] (!%p220_p9)  ;;  %319 = vmatprep.mubr.bf16.mxu0 (!%p220_p9), %v977_v7  ;;  %360 = vmatprep.mubr.bf16.mxu1 (!%p220_p9), %v977_v7  ;;  %s241_s16 = sand.u32 (!%p220_p9), 1, %s967_s22  }
   0xf   : > { %v280_v3 = vpack.c.bf16 (!%p220_p9), %v276_v1, %v272_v0  ;;  %v282_v8 = vpack.c.bf16 (!%p220_p9), %v278_v4, %v274_v2  ;;  %v279_v9 = vpack.c.bf16 (!%p220_p9), %v275_v6, %v271_v5  ;;  %v273_v10 = vld [vmem:[%s1338_s1 + $0x10] sm:$0xff] (!%p220_p9)  ;;  %v394_v12 = vld [vmem:[%s1339_s2 + $0x80] sm:$0xff] (!%p220_p9)  ;;  %v395_v14 = vld [vmem:[%s1339_s2 + $0x88] sm:$0xff] (!%p220_p9)  ;;  %s725_s17 = sshll.u32 (!%p220_p9), %s241_s16, 3  ;;  %s738_s20 = sshll.u32 (!%p220_p9), %s1035_s25, 7 }
  0x10   : > { %v277_v11 = vld [vmem:[%s1338_s1 + $0x30] sm:$0xff] (!%p220_p9)  ;;  %v498_v15 = vld [vmem:[%s1340_s3 + $0x80] sm:$0xff] (!%p220_p9)  ;;  %v499_v16 = vld [vmem:[%s1340_s3 + $0x88] sm:$0xff] (!%p220_p9)  ;;  %v809_v17 = vpack.c.bf16 (!%p220_p9), %v395_v14, %v394_v12  ;;  %s243_s18 = scalar_lea.vmem (!%p220_p9), [#allocation2], %s725_s17  ;;  %s1293_s9 = scalar_lea.hbm (!%p220_p9), %s1341_s4, %s738_s20 }
  0x11   : > { %287 = vmatprep.subr.bf16.mxu0 (!%p220_p9), %v280_v3  ;;  %v281_v13 = vpack.c.bf16 (!%p220_p9), %v277_v11, %v273_v10  ;;  %328 = vmatprep.subr.bf16.mxu1 (!%p220_p9), %v282_v8  ;;  %v841_v18 = vpack.c.bf16 (!%p220_p9), %v499_v16, %v498_v15  ;;  %v378_v19 = vld [vmem:[%s1339_s2] sm:$0xff] (!%p220_p9)  ;;  %v379_v20 = vld [vmem:[%s1339_s2 + $0x8] sm:$0xff] (!%p220_p9)  ;;  %v396_v23 = vld [vmem:[%s1339_s2 + $0x90] sm:$0xff] (!%p220_p9)  ;;  %s608_s26 = sshll.u32 (!%p220_p9), %s243_s18, 4  ;;  %s586_s11 = scalar_lea.sflag (!%p220_p9), [#allocation3], %s241_s16  ;;  %s609_s26 = int_to_ptr.vmem [resolvable:$true] %s608_s26 }
  0x12   : > { %288 = vmatpush1.bf16.msra.mxu0 (!%p220_p9), %v279_v9  ;;  %v482_v21 = vld [vmem:[%s1340_s3] sm:$0xff] (!%p220_p9)  ;;  %v483_v22 = vld [vmem:[%s1340_s3 + $0x8] sm:$0xff] (!%p220_p9)  ;;  %v397_v24 = vld [vmem:[%s1339_s2 + $0x98] sm:$0xff] (!%p220_p9)  ;;  %v811_v26 = vpack.c.bf16 (!%p220_p9), %v379_v20, %v378_v19  ;;  %s913_s12 = scalar_lea.vmem (!%p220_p9), %s609_s26, 128  ;;  %s978_s13 = smov (!%p220_p9), [#allocation2]  }
  0x13   : > { %329 = vmatpush1.bf16.msra.mxu1 (!%p220_p9), %v281_v13  ;;  %810 = vmatprep.subr.bf16.mxu0 (!%p220_p9), %v809_v17  ;;  %v843_v27 = vpack.c.bf16 (!%p220_p9), %v483_v22, %v482_v21  ;;  %v500_v28 = vld [vmem:[%s1340_s3 + $0x90] sm:$0xff] (!%p220_p9)  ;;  %v501_v29 = vld [vmem:[%s1340_s3 + $0x98] sm:$0xff] (!%p220_p9)  ;;  %v813_v31 = vpack.c.bf16 (!%p220_p9), %v397_v24, %v396_v23  ;;  %v398_v37 = vld [vmem:[%s1339_s2 + $0xa0] sm:$0xff] (!%p220_p9)  ;;  %p914_p11 = scmp.ne.s32.totalorder (!%p220_p9), %s609_s26, %s913_s12 }
  0x14   : > { %842 = vmatprep.subr.bf16.mxu1 (!%p220_p9), %v841_v18  ;;  %v845_v32 = vpack.c.bf16 (!%p220_p9), %v501_v29, %v500_v28  ;;  %v380_v33 = vld [vmem:[%s1339_s2 + $0x10] sm:$0xff] (!%p220_p9)  ;;  %v381_v34 = vld [vmem:[%s1339_s2 + $0x18] sm:$0xff] (!%p220_p9)  ;;  %v399_v38 = vld [vmem:[%s1339_s2 + $0xa8] sm:$0xff] (!%p220_p9) }
  0x15   : > { %s257_s10 = scalar_select %p256_p10, %s1035_s25, 3  ;;  %v484_v35 = vld [vmem:[%s1340_s3 + $0x10] sm:$0xff]  ;;  %v485_v36 = vld [vmem:[%s1340_s3 + $0x18] sm:$0xff]  ;;  %v502_v39 = vld [vmem:[%s1340_s3 + $0xa0] sm:$0xff]  ;;  %v815_v41 = vpack.c.bf16 %v381_v34, %v380_v33  ;;  %v817_v45 = vpack.c.bf16 %v399_v38, %v398_v37 }
  0x16   : > { %v503_v40 = vld [vmem:[%s1340_s3 + $0xa8] sm:$0xff]  ;;  %v847_v42 = vpack.c.bf16 %v485_v36, %v484_v35  ;;  %v382_v43 = vld [vmem:[%s1339_s2 + $0x20] sm:$0xff]  ;;  %v400_v49 = vld [vmem:[%s1339_s2 + $0xb0] sm:$0xff]  ;;  %p915_p12 = pnand %p914_p11, %p1052_p5 }
  0x17   : > { %s1100_s19 = sshll.u32 %s257_s10, 3  ;;  %v383_v44 = vld [vmem:[%s1339_s2 + $0x28] sm:$0xff]  ;;  %v849_v46 = vpack.c.bf16 %v503_v40, %v502_v39  ;;  %v486_v47 = vld [vmem:[%s1340_s3 + $0x20] sm:$0xff]  ;;  %v401_v50 = vld [vmem:[%s1339_s2 + $0xb8] sm:$0xff] }
  0x18   : > { %s259_s10 = scalar_lea.vmem %s1337_s0, %s1100_s19  ;;  %v487_v48 = vld [vmem:[%s1340_s3 + $0x28] sm:$0xff]  ;;  %v504_v51 = vld [vmem:[%s1340_s3 + $0xb0] sm:$0xff]  ;;  %v505_v52 = vld [vmem:[%s1340_s3 + $0xb8] sm:$0xff]  ;;  %v819_v53 = vpack.c.bf16 %v383_v44, %v382_v43  ;;  %v821_v57 = vpack.c.bf16 %v401_v50, %v400_v49  ;;  %p916_p13 = pneg %p915_p12 }
  0x19   : > { %v269_v25 = vld [vmem:[%s259_s10] sm:$0xff]  ;;  %v851_v54 = vpack.c.bf16 %v487_v48, %v486_v47  ;;  %v384_v55 = vld [vmem:[%s1339_s2 + $0x30] sm:$0xff]  ;;  %v385_v56 = vld [vmem:[%s1339_s2 + $0x38] sm:$0xff]  ;;  %v853_v58 = vpack.c.bf16 %v505_v52, %v504_v51  ;;  %s917_s10 = sshll.u32 %s978_s13, 4  ;;  %s918_s10 = int_to_ptr.vmem [resolvable:$false] %s917_s10 }
  0x1a   : > { %v270_v30 = vpack.c.bf16 %v269_v25, %v269_v25  ;;  %v488_v59 = vld [vmem:[%s1340_s3 + $0x30] sm:$0xff]  ;;  %v489_v60 = vld [vmem:[%s1340_s3 + $0x38] sm:$0xff]  ;;  %v402_v61 = vld [vmem:[%s1339_s2 + $0xc0] sm:$0xff]  ;;  %v823_v1 = vpack.c.bf16 %v385_v56, %v384_v55  ;;  %s919_s14 = scalar_lea.vmem %s918_s10, 256  ;;  %p920_p0 = scmp.lt.s32.totalorder %s609_s26, %s918_s10 }
  0x1b   : > { %v403_v62 = vld [vmem:[%s1339_s2 + $0xc8] sm:$0xff]  ;;  %v506_v63 = vld [vmem:[%s1340_s3 + $0xc0] sm:$0xff]  ;;  %v855_v2 = vpack.c.bf16 %v489_v60, %v488_v59  ;;  %v404_v9 = vld [vmem:[%s1339_s2 + $0xd0] sm:$0xff]  ;;  %p921_p1 = scmp.lt.s32.totalorder %s919_s14, %s913_s12 }
  0x1c   : > { %729 = vmatmul.mubr.msk.bf16.vlgmr.msra.gmra.mrb[0].mxu0 %vm283_vm0, %v270_v30  ;;  %730 = vmatmul.mubr.msk.bf16.vlgmr.msra.gmra.mrb[0].mxu1 %vm283_vm0, %v270_v30  ;;  %v507_v0 = vld [vmem:[%s1340_s3 + $0xc8] sm:$0xff]  ;;  %v386_v3 = vld [vmem:[%s1339_s2 + $0x40] sm:$0xff]  ;;  %v825_v5 = vpack.c.bf16 %v403_v62, %v402_v61  ;;  %v405_v10 = vld [vmem:[%s1339_s2 + $0xd8] sm:$0xff] }
  0x1d   : > { %812 = vmatpush3.bf16.msra.mxu0 %v811_v26  ;;  %844 = vmatpush3.bf16.msra.mxu1 %v843_v27  ;;  %v387_v4 = vld [vmem:[%s1339_s2 + $0x48] sm:$0xff]  ;;  %v857_v6 = vpack.c.bf16 %v507_v0, %v506_v63  ;;  %v490_v7 = vld [vmem:[%s1340_s3 + $0x40] sm:$0xff]  ;;  %v508_v11 = vld [vmem:[%s1340_s3 + $0xd0] sm:$0xff]  ;;  %v829_v17 = vpack.c.bf16 %v405_v10, %v404_v9  ;;  %p922_p2 = por %p921_p1, %p920_p0 }
  0x1e   : > { %814 = vmatprep.subr.bf16.mxu0 %v813_v31  ;;  %846 = vmatprep.subr.bf16.mxu1 %v845_v32  ;;  %v491_v8 = vld [vmem:[%s1340_s3 + $0x48] sm:$0xff]  ;;  %v509_v12 = vld [vmem:[%s1340_s3 + $0xd8] sm:$0xff]  ;;  %v827_v13 = vpack.c.bf16 %v387_v4, %v386_v3  ;;  %v388_v15 = vld [vmem:[%s1339_s2 + $0x50] sm:$0xff] }
  0x1f   : > { %v859_v14 = vpack.c.bf16 %v491_v8, %v490_v7  ;;  %v389_v16 = vld [vmem:[%s1339_s2 + $0x58] sm:$0xff]  ;;  %v861_v18 = vpack.c.bf16 %v509_v12, %v508_v11  ;;  %v492_v19 = vld [vmem:[%s1340_s3 + $0x50] sm:$0xff]  ;;  %v406_v21 = vld [vmem:[%s1339_s2 + $0xe0] sm:$0xff]  ;;  %p923_p3 = pnand %p922_p2, %p916_p13 }
  0x20   : > { %v493_v20 = vld [vmem:[%s1340_s3 + $0x58] sm:$0xff]  ;;  %v407_v22 = vld [vmem:[%s1339_s2 + $0xe8] sm:$0xff]  ;;  %v510_v23 = vld [vmem:[%s1340_s3 + $0xe0] sm:$0xff]  ;;  %v831_v25 = vpack.c.bf16 %v389_v16, %v388_v15 }
  0x21   : > { %816 = vmatpush3.bf16.msra.mxu0 %v815_v41  ;;  %848 = vmatpush3.bf16.msra.mxu1 %v847_v42  ;;  %v511_v24 = vld [vmem:[%s1340_s3 + $0xe8] sm:$0xff]  ;;  %v863_v26 = vpack.c.bf16 %v493_v20, %v492_v19  ;;  %v390_v27 = vld [vmem:[%s1339_s2 + $0x60] sm:$0xff]  ;;  %v833_v29 = vpack.c.bf16 %v407_v22, %v406_v21  ;;  %v408_v33 = vld [vmem:[%s1339_s2 + $0xf0] sm:$0xff] }
  0x22   : > { %818 = vmatprep.subr.bf16.mxu0 %v817_v45  ;;  %850 = vmatprep.subr.bf16.mxu1 %v849_v46  ;;  %v391_v28 = vld [vmem:[%s1339_s2 + $0x68] sm:$0xff]  ;;  %v865_v30 = vpack.c.bf16 %v511_v24, %v510_v23  ;;  %v494_v31 = vld [vmem:[%s1340_s3 + $0x60] sm:$0xff]  ;;  %v409_v34 = vld [vmem:[%s1339_s2 + $0xf8] sm:$0xff] }
  0x23   : > { %v495_v32 = vld [vmem:[%s1340_s3 + $0x68] sm:$0xff]  ;;  %v512_v35 = vld [vmem:[%s1340_s3 + $0xf0] sm:$0xff]  ;;  %v513_v36 = vld [vmem:[%s1340_s3 + $0xf8] sm:$0xff]  ;;  %v835_v37 = vpack.c.bf16 %v391_v28, %v390_v27  ;;  %v837_v39 = vpack.c.bf16 %v409_v34, %v408_v33 }
  0x24   : > { %v867_v38 = vpack.c.bf16 %v495_v32, %v494_v31  ;;  %v869_v40 = vpack.c.bf16 %v513_v36, %v512_v35  ;;  %v392_v41 = vld [vmem:[%s1339_s2 + $0x70] sm:$0xff]  ;;  %v393_v42 = vld [vmem:[%s1339_s2 + $0x78] sm:$0xff] }
  0x25   : > { %820 = vmatpush3.bf16.msra.mxu0 %v819_v53  ;;  %852 = vmatpush3.bf16.msra.mxu1 %v851_v54  ;;  %v496_v43 = vld [vmem:[%s1340_s3 + $0x70] sm:$0xff]  ;;  %v839_v44 = vpack.c.bf16 %v393_v42, %v392_v41  ;;  %v497_v45 = vld [vmem:[%s1340_s3 + $0x78] sm:$0xff] }
  0x26   : > { %822 = vmatprep.subr.bf16.mxu0 %v821_v57  ;;  %854 = vmatprep.subr.bf16.mxu1 %v853_v58  ;;  %v871_v46 = vpack.c.bf16 %v497_v45, %v496_v43 }
  0x29   : > { %824 = vmatpush3.bf16.msra.mxu0 %v823_v1  ;;  %856 = vmatpush3.bf16.msra.mxu1 %v855_v2 }
  0x2a   : > { %826 = vmatprep.subr.bf16.mxu0 %v825_v5  ;;  %858 = vmatprep.subr.bf16.mxu1 %v857_v6 }
  0x2d   : > { %828 = vmatpush3.bf16.msra.mxu0 %v827_v13  ;;  %860 = vmatpush3.bf16.msra.mxu1 %v859_v14 }
  0x2e   : > { %830 = vmatprep.subr.bf16.mxu0 %v829_v17  ;;  %862 = vmatprep.subr.bf16.mxu1 %v861_v18 }
  0x31   : > { %832 = vmatpush3.bf16.msra.mxu0 %v831_v25  ;;  %864 = vmatpush3.bf16.msra.mxu1 %v863_v26 }
  0x32   : > { %834 = vmatprep.subr.bf16.mxu0 %v833_v29  ;;  %866 = vmatprep.subr.bf16.mxu1 %v865_v30 }
  0x35   : > { %836 = vmatpush3.bf16.msra.mxu0 %v835_v37  ;;  %868 = vmatpush3.bf16.msra.mxu1 %v867_v38 }
  0x36   : > { %838 = vmatprep.subr.bf16.mxu0 %v837_v39  ;;  %870 = vmatprep.subr.bf16.mxu1 %v869_v40 }
  0x39   : > { %840 = vmatpush3.bf16.msra.mxu0 %v839_v44  ;;  %872 = vmatpush3.bf16.msra.mxu1 %v871_v46 }
  0xef   : > { %v321_v47 = vpop.f32.mrb[0].mxu0  ;;  %v362_v48 = vpop.f32.mrb[0].mxu1 }
  0xf0   : > { %v323_v49 = vpop.f32.mrb[1].mxu0  ;;  %v364_v50 = vpop.f32.mrb[1].mxu1 }
  0xf1   : > { %v737_v51 = vpack.c.bf16 %v323_v49, %v321_v47  ;;  %v325_v52 = vpop.f32.mrb[2].mxu0  ;;  %v366_v53 = vpop.f32.mrb[2].mxu1  ;;  %474 = vmatprep.mubr.f32.mxu0 %v323_v49  ;;  %578 = vmatprep.mubr.f32.mxu1 %v364_v50 }
  0xf2   : > { %v326_v54 = vpop.f32.mrb[3].mxu0  ;;  %v367_v55 = vpop.f32.mrb[3].mxu1  ;;  %475 = vmatmul.mubr.f32.vlgmr.msra.gmra.mrb[4].mxu0 %v321_v47  ;;  %579 = vmatmul.mubr.f32.vlgmr.msra.gmra.mrb[4].mxu1 %v362_v48 }
  0xf3   : > { %377 = vst [vmem:[%s243_s18] sm:$0xff] %v737_v51 }
  0xf4   : > { %926 = shalt.err (!%p923_p3)
}
  0xf5   : > { %s927_s25 = scalar_lea.hbm %s1293_s9, 128  ;;  %s931_s17 = scalar_lea.hbm %s1341_s4, 512 }
  0xf6   : > { %p928_p4 = scmp.ne.s32.totalorder %s1293_s9, %s927_s25  ;;  %p932_p9 = scmp.lt.u32.totalorder %s1293_s9, %s1341_s4 }
  0xf7   : > { %p933_p10 = scmp.lt.u32.totalorder %s931_s17, %s927_s25  ;;  %p935_p12 = scmp.lt.u32.totalorder %s927_s25, %s1293_s9 }
  0xf8   : > { %p929_p7 = pnand %p928_p4, %p1052_p5 }
  0xf9   : > { %p934_p11 = por %p933_p10, %p932_p9 }
  0xfa   : > { %p930_p8 = pneg %p929_p7 }
  0xfb   : > { %p936_p13 = por %p935_p12, %p934_p11 }
  0xfd   : > { %p937_p0 = pnand %p936_p13, %p930_p8 }
  0xff   : > { %940 = shalt.err (!%p937_p0)
}
 0x100   : > { %873 = dma.vmem_to_hbm [thread:$0]  (%p1052_p5), %s609_s26, 128, %s1293_s9, %s586_s11   ;;  %vm480_vm1 = vcmask 64512  }
 0x101   : > { %s263_s12 = scalar_lea.vmem %s1342_s5, %s1100_s19  ;;  %s267_s14 = scalar_lea.vmem %s1343_s6, %s1100_s19 }
 0x1c5   : > { %v771_v56 = vpop.f32.mrb[4].mxu0  ;;  %v806_v57 = vpop.f32.mrb[4].mxu1 }
 0x1c6   : > { %v772_v58 = vpop.f32.mrb[5].mxu0  ;;  %v807_v59 = vpop.f32.mrb[5].mxu1 }
 0x1c7   : > { %v773_v60 = vadd.f32 %v772_v58, %v771_v56  ;;  %v808_v61 = vadd.f32 %v807_v59, %v806_v57 }
 0x1c9   : > { %481 = vst.msk [vmem:[%s263_s12] sm:$0xff] %vm480_vm1, %v773_v60  ;;  %584 = vst.msk [vmem:[%s267_s14] sm:$0xff] %vm480_vm1, %v808_v61 }
 0x1ca PF: > { %p879_p5 = scmp.ge.s32.totalorder %s975_s24, 2  ;;  %s626_s7 = sand.u32 1, %s963_s21  }
 0x1cb   : > { %s627_s26 = scalar_lea.sflag [#allocation3], %s626_s7 }
 0x1cc   : > { %p876_p1 = pnand %p879_p5, %p1056_p6 }
 0x1ce   : > { %958 = dma.done.wait (!%p876_p1), %s627_s26, 128  }
 0x1cf   : > { %960 = vsyncadd (!%p876_p1), %s627_s26, 4294967168  ;;  %p17_p2 = scmp.ge.s32.totalorder %s1039_s27, 6   ;;  %s1346_s21 = smov %s967_s22 }
 0x1d0   : > { %s1347_s22 = smov %s971_s23  ;;  %s1348_s23 = smov %s1050_s30 }
 0x1d1   : > { %s1349_s24 = smov %s1039_s27  ;;  %19 = sbr.rel (!%p17_p2) target bundleno = 3 (0x3), region = 95 }
 0x1d8   :  { %646 = vsyncpa [#allocation3], 1 }
 0x1d9   :  { %648 = vsyncpa [#allocation3 + $0x1], 1 }

</bundles_post_ra>
